<compile_context>
chip_gen: v7x
topology: tpu7x:2x2x1
jax: 0.10.0
libtpu: 0.0.40
codegen_flags: <defaults>
</compile_context>

<pallas_src>
import functools

import numpy as np
import jax
import jax.numpy as jnp
from jax.experimental import pallas as pl
from jax.experimental.pallas import tpu as pltpu


def _round_up(x, m):
    return ((x + m - 1) // m) * m


def _cnn_kernel(
    x_ref,        # (B*S, E)   flattened inputs
    win_ref,      # (E, E)     fc_input weight (in, out)
    bin_ref,      # (1, E)
    wtaps_ref,    # (Kmax, E, C)  all branches per tap, zero-padded to Kmax taps
    bconv_ref,    # (1, C)     concatenated conv biases
    mask_ref,     # (B*Tpad, C) 1.0 at valid conv-output positions, else 0.0
    wfc_ref,      # (C, OUT_PAD)  fc weight, lane-padded
    bfc_ref,      # (1, OUT_PAD)
    out_ref,      # (B, OUT_PAD)
    pbuf_ref,     # scratch VMEM (M_scratch, E): per-batch padded blocks
    cat_ref,      # scratch VMEM (B, C): pooled features
    *,
    batch,
    seq_len,
    pad,
    kmax,
    tpad,
):
    m_out = batch * tpad

    # ---- fc_input for the whole batch in one matmul -------------------------
    emb = jnp.dot(x_ref[...], win_ref[...], preferred_element_type=jnp.float32)
    emb = emb + bin_ref[...]                                   # (B*S, E)

    # ---- lay out left-padded per-batch blocks in a flat scratch -------------
    # block b occupies rows [b*Tpad, (b+1)*Tpad): pad zeros | emb[b] | zeros
    pbuf_ref[...] = jnp.zeros_like(pbuf_ref)
    for b in range(batch):
        pbuf_ref[pl.ds(b * tpad + pad, seq_len), :] = emb[b * seq_len:(b + 1) * seq_len, :]

    # ---- all conv branches, all taps, whole batch: Kmax matmuls -------------
    acc = jnp.dot(pbuf_ref[pl.ds(0, m_out), :], wtaps_ref[0],
                  preferred_element_type=jnp.float32)
    for k in range(1, kmax):
        acc = acc + jnp.dot(pbuf_ref[pl.ds(k, m_out), :], wtaps_ref[k],
                            preferred_element_type=jnp.float32)
    conved = jnp.maximum(acc + bconv_ref[...], 0.0)            # bias epilogue + ReLU
    # zero out out-of-range / cross-batch positions; ReLU output >= 0 so the
    # max-pool below is unaffected by the masked zeros.
    masked = conved * mask_ref[...]

    # ---- per-batch max-pool over time, assembled into (B, C) ----------------
    for b in range(batch):
        pooled = jnp.max(masked[b * tpad:(b + 1) * tpad, :], axis=0, keepdims=True)
        cat_ref[pl.ds(b, 1), :] = pooled

    # TODO(synk): nn.Dropout is identity in eval/inference; no RNG masking applied.
    # ---- final fc: one matmul, single lane-dense output store ---------------
    out_ref[...] = (jnp.dot(cat_ref[...], wfc_ref[...],
                            preferred_element_type=jnp.float32) + bfc_ref[...])


def cnn_forward(x, params, *, filter_sizes):
    """x: (B, S, E) float32. Returns (B, output_dim) float32."""
    B, S, E = x.shape
    NF = params["conv_w"][0].shape[2]
    OUT = params["fc_w"].shape[1]
    nb = len(filter_sizes)
    C = nb * NF
    kmax = max(filter_sizes)
    pad = kmax - 1
    tpad = _round_up(S + pad, 8)                  # per-batch block length (aligned)
    m_out = B * tpad                              # rows of fused conv output
    m_scratch = m_out + _round_up(kmax - 1, 8)    # extra zero tail so tap windows stay in-bounds
    out_pad = _round_up(max(OUT, 128), 128)       # lane-dense output width

    # --- layout plumbing outside the kernel (pure rearrange / zero-pad) ------
    x_flat = x.reshape(B * S, E)

    wtaps = jnp.zeros((kmax, E, C), jnp.float32)
    for j, ks in enumerate(filter_sizes):
        wtaps = wtaps.at[:ks, :, j * NF:(j + 1) * NF].set(params["conv_w"][j])
    bconv = jnp.concatenate(list(params["conv_b"]), axis=1)            # (1, C)

    mask_np = np.zeros((m_out, C), np.float32)
    for j, ks in enumerate(filter_sizes):
        L = S + pad - ks + 1                      # valid conv output length for this branch
        for b in range(B):
            mask_np[b * tpad:b * tpad + L, j * NF:(j + 1) * NF] = 1.0
    mask = jnp.asarray(mask_np)

    wfc = jnp.zeros((C, out_pad), jnp.float32).at[:, :OUT].set(params["fc_w"])
    bfc = jnp.zeros((1, out_pad), jnp.float32).at[:, :OUT].set(params["fc_b"])

    kernel = functools.partial(
        _cnn_kernel, batch=B, seq_len=S, pad=pad, kmax=kmax, tpad=tpad)

    full2 = lambda i: (0, 0)
    full3 = lambda i: (0, 0, 0)
    in_specs = [
        pl.BlockSpec((B * S, E), full2),          # x_flat
        pl.BlockSpec((E, E), full2),              # W_in^T
        pl.BlockSpec((1, E), full2),              # b_in
        pl.BlockSpec((kmax, E, C), full3),        # fused conv weights per tap
        pl.BlockSpec((1, C), full2),              # fused conv bias
        pl.BlockSpec((m_out, C), full2),          # validity mask
        pl.BlockSpec((C, out_pad), full2),        # W_fc^T (lane-padded)
        pl.BlockSpec((1, out_pad), full2),        # b_fc (lane-padded)
    ]

    out_padded = pl.pallas_call(
        kernel,
        out_shape=jax.ShapeDtypeStruct((B, out_pad), jnp.float32),
        grid_spec=pltpu.PrefetchScalarGridSpec(
            num_scalar_prefetch=0,
            grid=(1,),                            # single step: no per-batch grid overhead
            in_specs=in_specs,
            out_specs=pl.BlockSpec((B, out_pad), full2),
            scratch_shapes=[
                pltpu.VMEM((m_scratch, E), jnp.float32),
                pltpu.VMEM((B, C), jnp.float32),
            ],
        ),
        compiler_params=pltpu.CompilerParams(
            dimension_semantics=("arbitrary",)),
    )(x_flat, params["fc_in_w"], params["fc_in_b"], wtaps, bconv, mask, wfc, bfc)

    return out_padded[:, :OUT]


def cnn_reference(x, params, *, filter_sizes):
    """Pure-JAX reference mirroring the PyTorch forward (eval mode)."""
    pad = max(filter_sizes) - 1
    emb = x @ params["fc_in_w"] + params["fc_in_b"]                 # (B,S,E)
    emb = jnp.pad(emb, ((0, 0), (pad, 0), (0, 0)))                  # left-pad seq
    pooled = []
    for i, ks in enumerate(filter_sizes):
        W = params["conv_w"][i]                                     # (K,E,NF)
        b = params["conv_b"][i]                                     # (1,NF)
        L = emb.shape[1] - ks + 1
        acc = jnp.broadcast_to(b, (x.shape[0], L, W.shape[2]))
        for k in range(ks):
            acc = acc + emb[:, k:k + L, :] @ W[k]
        conved = jnp.maximum(acc, 0.0)
        pooled.append(jnp.max(conved, axis=1))                      # (B,NF)
    cat = jnp.concatenate(pooled, axis=1)
    return cat @ params["fc_w"] + params["fc_b"]


def init_params(key, *, embedding_dim, n_filters, filter_sizes, output_dim):
    keys = jax.random.split(key, 4 + 2 * len(filter_sizes))
    scale = 0.1
    params = {
        # stored transposed: (in_features, out_features)
        "fc_in_w": scale * jax.random.normal(
            keys[0], (embedding_dim, embedding_dim), jnp.float32),
        "fc_in_b": scale * jax.random.normal(keys[1], (1, embedding_dim), jnp.float32),
        "fc_w": scale * jax.random.normal(
            keys[2], (len(filter_sizes) * n_filters, output_dim), jnp.float32),
        "fc_b": scale * jax.random.normal(keys[3], (1, output_dim), jnp.float32),
        "conv_w": [],
        "conv_b": [],
    }
    for i, ks in enumerate(filter_sizes):
        # stored as (K, E, NF) == torch (NF, E, K) transposed for tap-matmul
        params["conv_w"].append(scale * jax.random.normal(
            keys[4 + 2 * i], (ks, embedding_dim, n_filters), jnp.float32))
        params["conv_b"].append(scale * jax.random.normal(
            keys[5 + 2 * i], (1, n_filters), jnp.float32))
    return params


if __name__ == "__main__":
    B, S = 2, 8
    embedding_dim = 32
    n_filters = 8
    filter_sizes = (2, 3, 4, 5)
    output_dim = 3

    key = jax.random.PRNGKey(0)
    k_x, k_p = jax.random.split(key)
    x = jax.random.normal(k_x, (B, S, embedding_dim), jnp.float32)
    params = init_params(
        k_p,
        embedding_dim=embedding_dim,
        n_filters=n_filters,
        filter_sizes=filter_sizes,
        output_dim=output_dim,
    )

    out = cnn_forward(x, params, filter_sizes=filter_sizes)
    out = jax.block_until_ready(out)

    ref = cnn_reference(x, params, filter_sizes=filter_sizes)
    assert out.shape == (B, output_dim)
    assert jnp.allclose(out, ref, atol=1e-4, rtol=1e-4), (out, ref)

    print("KERNEL_OK")
</pallas_src>

<mosaic_0001>
module attributes {stable_mosaic.version = 11 : i64} {
  func.func @_cnn_kernel(%arg0: i32, %arg1: memref<16x32xf32, #tpu.memory_space<vmem>>, %arg2: memref<32x32xf32, #tpu.memory_space<vmem>>, %arg3: memref<1x32xf32, #tpu.memory_space<vmem>>, %arg4: memref<5x32x32xf32, #tpu.memory_space<vmem>>, %arg5: memref<1x32xf32, #tpu.memory_space<vmem>>, %arg6: memref<32x32xf32, #tpu.memory_space<vmem>>, %arg7: memref<32x128xf32, #tpu.memory_space<vmem>>, %arg8: memref<1x128xf32, #tpu.memory_space<vmem>>, %arg9: memref<2x128xf32, #tpu.memory_space<vmem>>, %arg10: memref<40x32xf32, #tpu.memory_space<vmem>>, %arg11: memref<2x32xf32, #tpu.memory_space<vmem>>) attributes {dimension_semantics = [#tpu.dimension_semantics<arbitrary>], iteration_bounds = array<i64: 1>, scalar_prefetch = 0 : i64, scratch_operands = 2 : i64, tpu.core_type = #tpu.core_type<tc>, window_params = [{pipeline_mode = #tpu.pipeline_mode<synchronous>, transform_indices = @transform_0, window_bounds = array<i64: 16, 32>}, {pipeline_mode = #tpu.pipeline_mode<synchronous>, transform_indices = @transform_1, window_bounds = array<i64: 32, 32>}, {pipeline_mode = #tpu.pipeline_mode<synchronous>, transform_indices = @transform_2, window_bounds = array<i64: 1, 32>}, {pipeline_mode = #tpu.pipeline_mode<synchronous>, transform_indices = @transform_3, window_bounds = array<i64: 5, 32, 32>}, {pipeline_mode = #tpu.pipeline_mode<synchronous>, transform_indices = @transform_4, window_bounds = array<i64: 1, 32>}, {pipeline_mode = #tpu.pipeline_mode<synchronous>, transform_indices = @transform_5, window_bounds = array<i64: 32, 32>}, {pipeline_mode = #tpu.pipeline_mode<synchronous>, transform_indices = @transform_6, window_bounds = array<i64: 32, 128>}, {pipeline_mode = #tpu.pipeline_mode<synchronous>, transform_indices = @transform_7, window_bounds = array<i64: 1, 128>}, {pipeline_mode = #tpu.pipeline_mode<synchronous>, transform_indices = @transform_8, window_bounds = array<i64: 2, 128>}]} {
    %c0 = arith.constant 0 : index
    %c0_0 = arith.constant 0 : index
    %0 = vector.load %arg1[%c0, %c0_0] : memref<16x32xf32, #tpu.memory_space<vmem>>, vector<16x32xf32>
    %c0_1 = arith.constant 0 : index
    %c0_2 = arith.constant 0 : index
    %1 = vector.load %arg2[%c0_1, %c0_2] : memref<32x32xf32, #tpu.memory_space<vmem>>, vector<32x32xf32>
    %cst = arith.constant dense<0.000000e+00> : vector<16x32xf32>
    %2 = tpu.matmul %0, %1, %cst {dimension_numbers = #tpu.dot_dimension_numbers<[1], [0], [0], [1], [0, 0, 1, 1], [], []>} : vector<16x32xf32>, vector<32x32xf32>, vector<16x32xf32> -> vector<16x32xf32>
    %c0_3 = arith.constant 0 : index
    %c0_4 = arith.constant 0 : index
    %3 = vector.load %arg3[%c0_3, %c0_4] : memref<1x32xf32, #tpu.memory_space<vmem>>, vector<1x32xf32>
    %4 = vector.broadcast %3 : vector<1x32xf32> to vector<16x32xf32>
    %5 = arith.addf %2, %4 : vector<16x32xf32>
    %cst_5 = arith.constant 0.000000e+00 : f32
    %6 = vector.broadcast %cst_5 : f32 to vector<40x32xf32>
    %c0_6 = arith.constant 0 : index
    %c0_7 = arith.constant 0 : index
    %7 = vector.load %arg10[%c0_6, %c0_7] : memref<40x32xf32, #tpu.memory_space<vmem>>, vector<40x32xf32>
    tpu.vector_store %arg10[%c0_6, %c0_7], %6 {strides = array<i32>} : memref<40x32xf32, #tpu.memory_space<vmem>>, vector<40x32xf32>,
    %8 = vector.extract_strided_slice %5 {offsets = [0, 0], sizes = [8, 32], strides = [1, 1]} : vector<16x32xf32> to vector<8x32xf32>
    %c4 = arith.constant 4 : index
    %c0_8 = arith.constant 0 : index
    %9 = vector.load %arg10[%c4, %c0_8] : memref<40x32xf32, #tpu.memory_space<vmem>>, vector<8x32xf32>
    tpu.vector_store %arg10[%c4, %c0_8], %8 {strides = array<i32>} : memref<40x32xf32, #tpu.memory_space<vmem>>, vector<8x32xf32>,
    %10 = vector.extract_strided_slice %5 {offsets = [8, 0], sizes = [8, 32], strides = [1, 1]} : vector<16x32xf32> to vector<8x32xf32>
    %c20 = arith.constant 20 : index
    %c0_9 = arith.constant 0 : index
    %11 = vector.load %arg10[%c20, %c0_9] : memref<40x32xf32, #tpu.memory_space<vmem>>, vector<8x32xf32>
    tpu.vector_store %arg10[%c20, %c0_9], %10 {strides = array<i32>} : memref<40x32xf32, #tpu.memory_space<vmem>>, vector<8x32xf32>,
    %c0_10 = arith.constant 0 : index
    %c0_11 = arith.constant 0 : index
    %12 = vector.load %arg10[%c0_10, %c0_11] : memref<40x32xf32, #tpu.memory_space<vmem>>, vector<32x32xf32>
    %c0_12 = arith.constant 0 : index
    %c0_13 = arith.constant 0 : index
    %c0_14 = arith.constant 0 : index
    %13 = vector.load %arg4[%c0_12, %c0_13, %c0_14] : memref<5x32x32xf32, #tpu.memory_space<vmem>>, vector<1x32x32xf32>
    %14 = vector.shape_cast %13 : vector<1x32x32xf32> to vector<32x32xf32>
    %cst_15 = arith.constant dense<0.000000e+00> : vector<32x32xf32>
    %15 = tpu.matmul %12, %14, %cst_15 {dimension_numbers = #tpu.dot_dimension_numbers<[1], [0], [0], [1], [0, 0, 1, 1], [], []>} : vector<32x32xf32>, vector<32x32xf32>, vector<32x32xf32> -> vector<32x32xf32>
    %c1 = arith.constant 1 : index
    %c0_16 = arith.constant 0 : index
    %16 = vector.load %arg10[%c1, %c0_16] : memref<40x32xf32, #tpu.memory_space<vmem>>, vector<32x32xf32>
    %c1_17 = arith.constant 1 : index
    %c0_18 = arith.constant 0 : index
    %c0_19 = arith.constant 0 : index
    %17 = vector.load %arg4[%c1_17, %c0_18, %c0_19] : memref<5x32x32xf32, #tpu.memory_space<vmem>>, vector<1x32x32xf32>
    %18 = vector.shape_cast %17 : vector<1x32x32xf32> to vector<32x32xf32>
    %cst_20 = arith.constant dense<0.000000e+00> : vector<32x32xf32>
    %19 = tpu.matmul %16, %18, %cst_20 {dimension_numbers = #tpu.dot_dimension_numbers<[1], [0], [0], [1], [0, 0, 1, 1], [], []>} : vector<32x32xf32>, vector<32x32xf32>, vector<32x32xf32> -> vector<32x32xf32>
    %20 = arith.addf %15, %19 : vector<32x32xf32>
    %c2 = arith.constant 2 : index
    %c0_21 = arith.constant 0 : index
    %21 = vector.load %arg10[%c2, %c0_21] : memref<40x32xf32, #tpu.memory_space<vmem>>, vector<32x32xf32>
    %c2_22 = arith.constant 2 : index
    %c0_23 = arith.constant 0 : index
    %c0_24 = arith.constant 0 : index
    %22 = vector.load %arg4[%c2_22, %c0_23, %c0_24] : memref<5x32x32xf32, #tpu.memory_space<vmem>>, vector<1x32x32xf32>
    %23 = vector.shape_cast %22 : vector<1x32x32xf32> to vector<32x32xf32>
    %cst_25 = arith.constant dense<0.000000e+00> : vector<32x32xf32>
    %24 = tpu.matmul %21, %23, %cst_25 {dimension_numbers = #tpu.dot_dimension_numbers<[1], [0], [0], [1], [0, 0, 1, 1], [], []>} : vector<32x32xf32>, vector<32x32xf32>, vector<32x32xf32> -> vector<32x32xf32>
    %25 = arith.addf %20, %24 : vector<32x32xf32>
    %c3 = arith.constant 3 : index
    %c0_26 = arith.constant 0 : index
    %26 = vector.load %arg10[%c3, %c0_26] : memref<40x32xf32, #tpu.memory_space<vmem>>, vector<32x32xf32>
    %c3_27 = arith.constant 3 : index
    %c0_28 = arith.constant 0 : index
    %c0_29 = arith.constant 0 : index
    %27 = vector.load %arg4[%c3_27, %c0_28, %c0_29] : memref<5x32x32xf32, #tpu.memory_space<vmem>>, vector<1x32x32xf32>
    %28 = vector.shape_cast %27 : vector<1x32x32xf32> to vector<32x32xf32>
    %cst_30 = arith.constant dense<0.000000e+00> : vector<32x32xf32>
    %29 = tpu.matmul %26, %28, %cst_30 {dimension_numbers = #tpu.dot_dimension_numbers<[1], [0], [0], [1], [0, 0, 1, 1], [], []>} : vector<32x32xf32>, vector<32x32xf32>, vector<32x32xf32> -> vector<32x32xf32>
    %30 = arith.addf %25, %29 : vector<32x32xf32>
    %c4_31 = arith.constant 4 : index
    %c0_32 = arith.constant 0 : index
    %31 = vector.load %arg10[%c4_31, %c0_32] : memref<40x32xf32, #tpu.memory_space<vmem>>, vector<32x32xf32>
    %c4_33 = arith.constant 4 : index
    %c0_34 = arith.constant 0 : index
    %c0_35 = arith.constant 0 : index
    %32 = vector.load %arg4[%c4_33, %c0_34, %c0_35] : memref<5x32x32xf32, #tpu.memory_space<vmem>>, vector<1x32x32xf32>
    %33 = vector.shape_cast %32 : vector<1x32x32xf32> to vector<32x32xf32>
    %cst_36 = arith.constant dense<0.000000e+00> : vector<32x32xf32>
    %34 = tpu.matmul %31, %33, %cst_36 {dimension_numbers = #tpu.dot_dimension_numbers<[1], [0], [0], [1], [0, 0, 1, 1], [], []>} : vector<32x32xf32>, vector<32x32xf32>, vector<32x32xf32> -> vector<32x32xf32>
    %35 = arith.addf %30, %34 : vector<32x32xf32>
    %c0_37 = arith.constant 0 : index
    %c0_38 = arith.constant 0 : index
    %36 = vector.load %arg5[%c0_37, %c0_38] : memref<1x32xf32, #tpu.memory_space<vmem>>, vector<1x32xf32>
    %37 = vector.broadcast %36 : vector<1x32xf32> to vector<32x32xf32>
    %38 = arith.addf %35, %37 : vector<32x32xf32>
    %cst_39 = arith.constant 0.000000e+00 : f32
    %39 = vector.broadcast %cst_39 : f32 to vector<32x32xf32>
    %40 = arith.maximumf %38, %39 : vector<32x32xf32>
    %c0_40 = arith.constant 0 : index
    %c0_41 = arith.constant 0 : index
    %41 = vector.load %arg6[%c0_40, %c0_41] : memref<32x32xf32, #tpu.memory_space<vmem>>, vector<32x32xf32>
    %42 = arith.mulf %40, %41 : vector<32x32xf32>
    %43 = vector.extract_strided_slice %42 {offsets = [0, 0], sizes = [16, 32], strides = [1, 1]} : vector<32x32xf32> to vector<16x32xf32>
    %cst_42 = arith.constant dense<0xFF800000> : vector<32xf32>
    %44 = vector.multi_reduction <maximumf>, %43, %cst_42 [0] : vector<16x32xf32> to vector<32xf32>
    %45 = vector.shape_cast %44 : vector<32xf32> to vector<1x32xf32>
    %c0_43 = arith.constant 0 : index
    %c0_44 = arith.constant 0 : index
    %46 = vector.load %arg11[%c0_43, %c0_44] : memref<2x32xf32, #tpu.memory_space<vmem>>, vector<1x32xf32>
    tpu.vector_store %arg11[%c0_43, %c0_44], %45 {strides = array<i32>} : memref<2x32xf32, #tpu.memory_space<vmem>>, vector<1x32xf32>,
    %47 = vector.extract_strided_slice %42 {offsets = [16, 0], sizes = [16, 32], strides = [1, 1]} : vector<32x32xf32> to vector<16x32xf32>
    %cst_45 = arith.constant dense<0xFF800000> : vector<32xf32>
    %48 = vector.multi_reduction <maximumf>, %47, %cst_45 [0] : vector<16x32xf32> to vector<32xf32>
    %49 = vector.shape_cast %48 : vector<32xf32> to vector<1x32xf32>
    %c1_46 = arith.constant 1 : index
    %c0_47 = arith.constant 0 : index
    %50 = vector.load %arg11[%c1_46, %c0_47] : memref<2x32xf32, #tpu.memory_space<vmem>>, vector<1x32xf32>
    tpu.vector_store %arg11[%c1_46, %c0_47], %49 {strides = array<i32>} : memref<2x32xf32, #tpu.memory_space<vmem>>, vector<1x32xf32>,
    %c0_48 = arith.constant 0 : index
    %c0_49 = arith.constant 0 : index
    %51 = vector.load %arg11[%c0_48, %c0_49] : memref<2x32xf32, #tpu.memory_space<vmem>>, vector<2x32xf32>
    %c0_50 = arith.constant 0 : index
    %c0_51 = arith.constant 0 : index
    %52 = vector.load %arg7[%c0_50, %c0_51] : memref<32x128xf32, #tpu.memory_space<vmem>>, vector<32x128xf32>
    %cst_52 = arith.constant dense<0.000000e+00> : vector<2x128xf32>
    %53 = tpu.matmul %51, %52, %cst_52 {dimension_numbers = #tpu.dot_dimension_numbers<[1], [0], [0], [1], [0, 0, 1, 1], [], []>} : vector<2x32xf32>, vector<32x128xf32>, vector<2x128xf32> -> vector<2x128xf32>
    %c0_53 = arith.constant 0 : index
    %c0_54 = arith.constant 0 : index
    %54 = vector.load %arg8[%c0_53, %c0_54] : memref<1x128xf32, #tpu.memory_space<vmem>>, vector<1x128xf32>
    %55 = vector.broadcast %54 : vector<1x128xf32> to vector<2x128xf32>
    %56 = arith.addf %53, %55 : vector<2x128xf32>
    %c0_55 = arith.constant 0 : index
    %c0_56 = arith.constant 0 : index
    %57 = vector.load %arg9[%c0_55, %c0_56] : memref<2x128xf32, #tpu.memory_space<vmem>>, vector<2x128xf32>
    tpu.vector_store %arg9[%c0_55, %c0_56], %56 {strides = array<i32>} : memref<2x128xf32, #tpu.memory_space<vmem>>, vector<2x128xf32>,
    return
  }
  func.func @transform_0(%arg0: i32) -> (i32, i32) {
    %c0_i32 = arith.constant 0 : i32
    %c0_i32_0 = arith.constant 0 : i32
    %c0_i32_1 = arith.constant 0 : i32
    return %c0_i32, %c0_i32_0 : i32, i32
  }
  func.func @transform_1(%arg0: i32) -> (i32, i32) {
    %c0_i32 = arith.constant 0 : i32
    %c0_i32_0 = arith.constant 0 : i32
    %c0_i32_1 = arith.constant 0 : i32
    return %c0_i32, %c0_i32_0 : i32, i32
  }
  func.func @transform_2(%arg0: i32) -> (i32, i32) {
    %c0_i32 = arith.constant 0 : i32
    %c0_i32_0 = arith.constant 0 : i32
    %c0_i32_1 = arith.constant 0 : i32
    return %c0_i32, %c0_i32_0 : i32, i32
  }
  func.func @transform_3(%arg0: i32) -> (i32, i32, i32) {
    %c0_i32 = arith.constant 0 : i32
    %c0_i32_0 = arith.constant 0 : i32
    %c0_i32_1 = arith.constant 0 : i32
    %c0_i32_2 = arith.constant 0 : i32
    return %c0_i32, %c0_i32_0, %c0_i32_1 : i32, i32, i32
  }
  func.func @transform_4(%arg0: i32) -> (i32, i32) {
    %c0_i32 = arith.constant 0 : i32
    %c0_i32_0 = arith.constant 0 : i32
    %c0_i32_1 = arith.constant 0 : i32
    return %c0_i32, %c0_i32_0 : i32, i32
  }
  func.func @transform_5(%arg0: i32) -> (i32, i32) {
    %c0_i32 = arith.constant 0 : i32
    %c0_i32_0 = arith.constant 0 : i32
    %c0_i32_1 = arith.constant 0 : i32
    return %c0_i32, %c0_i32_0 : i32, i32
  }
  func.func @transform_6(%arg0: i32) -> (i32, i32) {
    %c0_i32 = arith.constant 0 : i32
    %c0_i32_0 = arith.constant 0 : i32
    %c0_i32_1 = arith.constant 0 : i32
    return %c0_i32, %c0_i32_0 : i32, i32
  }
  func.func @transform_7(%arg0: i32) -> (i32, i32) {
    %c0_i32 = arith.constant 0 : i32
    %c0_i32_0 = arith.constant 0 : i32
    %c0_i32_1 = arith.constant 0 : i32
    return %c0_i32, %c0_i32_0 : i32, i32
  }
  func.func @transform_8(%arg0: i32) -> (i32, i32) {
    %c0_i32 = arith.constant 0 : i32
    %c0_i32_0 = arith.constant 0 : i32
    %c0_i32_1 = arith.constant 0 : i32
    return %c0_i32, %c0_i32_0 : i32, i32
  }
}

</mosaic_0001>

<bundles_post_ra>
// kernel: tpu_custom_call.1
= control target key start
LH: loop header
LB: loop body
LE: loop exit
PB: predicated region body
PF: predicated region fallthrough
CT: control target
= control target key end

     0   :  { %13 = vsyncpa [#allocation5], 0  ;;  %s1484_s0 = inlined_call_operand.hbm [shape: f32[16,32], index: 0, kind: input, shape index: {}]   ;;  %s1485_s1 = inlined_call_operand.hbm [shape: f32[32,32], index: 1, kind: input, shape index: {}]   ;;  %s1486_s2 = inlined_call_operand.vmem [shape: f32[1,32], index: 2, kind: input, shape index: {}]   ;;  %s1487_s3 = inlined_call_operand.hbm [shape: f32[5,32,32], index: 3, kind: input, shape index: {}]   ;;  %s1488_s4 = inlined_call_operand.vmem [shape: f32[1,32], index: 4, kind: input, shape index: {}]   ;;  %s1489_s5 = inlined_call_operand.hbm [shape: f32[32,32], index: 5, kind: input, shape index: {}]   ;;  %s1490_s6 = inlined_call_operand.hbm [shape: f32[32,128], index: 6, kind: input, shape index: {}]   ;;  %s1491_s7 = inlined_call_operand.vmem [shape: f32[1,128], index: 7, kind: input, shape index: {}]   ;;  %s1492_s8 = inlined_call_operand.hbm [shape: f32[2,128], index: 8, kind: output, shape index: {}]  }
   0x1   :  { %14 = vsyncpa [#allocation8], 0 }
   0x2   :  { %15 = vsyncpa [#allocation11], 0 }
   0x3   :  { %16 = vsyncpa [#allocation6], 0  ;;  %s1278_s27 = smov [#allocation7]   ;;  %s1279_s29 = smov [#allocation10]  }
   0x4   :  { %s34_s28 = sshll.u32 %s1278_s27, 4  ;;  %s62_s30 = sshll.u32 %s1279_s29, 4  ;;  %s35_s28 = int_to_ptr.vmem [resolvable:$true] %s34_s28  ;;  %s1334_s30 = int_to_ptr.vmem [resolvable:$true] %s62_s30 }
   0x5   :  { %s1138_s11 = scalar_lea.hbm %s1485_s1, 512 }
   0x6   :  { %p1139_p0 = scmp.ne.s32.totalorder %s1485_s1, %s1138_s11  ;;  %p1142_p1 = scmp.lt.u32.totalorder %s1138_s11, %s1485_s1 }
   0x8   :  { %p1144_p2 = pnand %p1142_p1, %p1139_p0 }
   0xa   :  { %1147 = shalt.err (!%p1144_p2)
}
   0xb   :  { %s1148_s16 = scalar_lea.vmem %s35_s28, 512  ;;  %p1153_p4 = scmp.lt.s32.totalorder %s35_s28, %s35_s28 }
   0xc   :  { %p1149_p3 = scmp.ne.s32.totalorder %s35_s28, %s1148_s16  ;;  %p1154_p5 = scmp.lt.s32.totalorder %s1148_s16, %s1148_s16 }
   0xe   :  { %p1155_p6 = por %p1154_p5, %p1153_p4 }
  0x10   :  { %p1156_p7 = pnand %p1155_p6, %p1149_p3 }
  0x12   :  { %1159 = shalt.err (!%p1156_p7)
}
  0x13   :  { %s1280_s17 = smov 128   ;;  %s1281_s18 = smov 8  }
  0x14   :  { %40 = dma.hbm_to_vmem [thread:$0]  %s1485_s1, 512, %s35_s28, [#allocation8], %s1280_s17, %s1280_s17, %s1281_s18  }
  0x15   :  { %s1160_s23 = scalar_lea.hbm %s1489_s5, 512 }
  0x16   :  { %p1161_p8 = scmp.ne.s32.totalorder %s1489_s5, %s1160_s23  ;;  %p1164_p9 = scmp.lt.u32.totalorder %s1160_s23, %s1489_s5 }
  0x18   :  { %p1166_p10 = pnand %p1164_p9, %p1161_p8 }
  0x1a   :  { %1169 = shalt.err (!%p1166_p10)
}
  0x1b   :  { %s1170_s29 = scalar_lea.vmem %s1334_s30, 512  ;;  %p1175_p12 = scmp.lt.s32.totalorder %s1334_s30, %s1334_s30 }
  0x1c   :  { %p1171_p11 = scmp.ne.s32.totalorder %s1334_s30, %s1170_s29  ;;  %p1176_p13 = scmp.lt.s32.totalorder %s1170_s29, %s1170_s29 }
  0x1e   :  { %p1177_p0 = por %p1176_p13, %p1175_p12 }
  0x20   :  { %p1178_p1 = pnand %p1177_p0, %p1171_p11 }
  0x22   :  { %1181 = shalt.err (!%p1178_p1)
}
  0x23   :  { %68 = dma.hbm_to_vmem [thread:$0]  %s1489_s5, 512, %s1334_s30, [#allocation11], %s1280_s17, %s1280_s17, %s1281_s18  }
  0x24   :  { %s1282_s9 = smov [#allocation4]   ;;  %s1283_s11 = smov [#allocation9]  }
  0x25   :  { %s22_s10 = sshll.u32 %s1282_s9, 4  ;;  %s48_s12 = sshll.u32 %s1283_s11, 4  ;;  %s23_s10 = int_to_ptr.vmem [resolvable:$true] %s22_s10  ;;  %s1371_s12 = int_to_ptr.vmem [resolvable:$true] %s48_s12 }
  0x26   :  { %s1182_s15 = scalar_lea.hbm %s1484_s0, 256 }
  0x27   :  { %p1183_p2 = scmp.ne.s32.totalorder %s1484_s0, %s1182_s15  ;;  %p1186_p3 = scmp.lt.u32.totalorder %s1182_s15, %s1484_s0 }
  0x29   :  { %p1188_p4 = pnand %p1186_p3, %p1183_p2 }
  0x2b   :  { %1191 = shalt.err (!%p1188_p4)
}
  0x2c   :  { %s1192_s5 = scalar_lea.vmem %s23_s10, 256  ;;  %p1197_p6 = scmp.lt.s32.totalorder %s23_s10, %s23_s10 }
  0x2d   :  { %p1193_p5 = scmp.ne.s32.totalorder %s23_s10, %s1192_s5  ;;  %p1198_p7 = scmp.lt.s32.totalorder %s1192_s5, %s1192_s5 }
  0x2f   :  { %p1199_p8 = por %p1198_p7, %p1197_p6 }
  0x31   :  { %p1200_p9 = pnand %p1199_p8, %p1193_p5 }
  0x33   :  { %1203 = shalt.err (!%p1200_p9)
}
  0x34   :  { %28 = dma.hbm_to_vmem [thread:$0]  %s1484_s0, 256, %s23_s10, [#allocation5], %s1280_s17, %s1280_s17, %s1281_s18  }
  0x35   :  { %s1204_s25 = scalar_lea.hbm %s1487_s3, 2560 }
  0x36   :  { %p1205_p10 = scmp.ne.s32.totalorder %s1487_s3, %s1204_s25  ;;  %p1208_p11 = scmp.lt.u32.totalorder %s1204_s25, %s1487_s3 }
  0x38   :  { %p1210_p12 = pnand %p1208_p11, %p1205_p10 }
  0x3a   :  { %1213 = shalt.err (!%p1210_p12)
}
  0x3b   :  { %s1214_s28 = scalar_lea.vmem %s1371_s12, 2560  ;;  %p1219_p0 = scmp.lt.s32.totalorder %s1371_s12, %s1371_s12 }
  0x3c   :  { %p1215_p13 = scmp.ne.s32.totalorder %s1371_s12, %s1214_s28  ;;  %p1220_p1 = scmp.lt.s32.totalorder %s1214_s28, %s1214_s28 }
  0x3e   :  { %p1221_p2 = por %p1220_p1, %p1219_p0 }
  0x40   :  { %p1222_p3 = pnand %p1221_p2, %p1215_p13 }
  0x42   :  { %1225 = shalt.err (!%p1222_p3)
}
  0x43   :  { %54 = dma.hbm_to_vmem [thread:$0]  %s1487_s3, 2560, %s1371_s12, [#allocation8], %s1280_s17, %s1280_s17, %s1281_s18  }
  0x44   :  { %s1284_s10 = smov [#allocation12]   ;;  %s1226_s15 = scalar_lea.hbm %s1490_s6, 512 }
  0x45   :  { %s74_s11 = sshll.u32 %s1284_s10, 4  ;;  %p1227_p4 = scmp.ne.s32.totalorder %s1490_s6, %s1226_s15  ;;  %s75_s11 = int_to_ptr.vmem [resolvable:$true] %s74_s11 }
  0x46   :  { %p1230_p5 = scmp.lt.u32.totalorder %s1226_s15, %s1490_s6 }
  0x48   :  { %p1232_p6 = pnand %p1230_p5, %p1227_p4 }
  0x4a   :  { %1235 = shalt.err (!%p1232_p6)
}
  0x4b   :  { %s1236_s5 = scalar_lea.vmem %s75_s11, 512  ;;  %p1241_p8 = scmp.lt.s32.totalorder %s75_s11, %s75_s11 }
  0x4c   :  { %p1237_p7 = scmp.ne.s32.totalorder %s75_s11, %s1236_s5  ;;  %p1242_p9 = scmp.lt.s32.totalorder %s1236_s5, %s1236_s5 }
  0x4e   :  { %p1243_p10 = por %p1242_p9, %p1241_p8 }
  0x50   :  { %p1244_p11 = pnand %p1243_p10, %p1237_p7 }
  0x52   :  { %1247 = shalt.err (!%p1244_p11)
}
  0x53   :  { %80 = dma.hbm_to_vmem [thread:$0]  %s1490_s6, 512, %s75_s11, [#allocation11], %s1280_s17, %s1280_s17, %s1281_s18  }
  0x54   :  { %1270 = dma.done.wait [#allocation5], 256  }
  0x55   :  { %1271 = vsyncadd [#allocation5], 4294967040 }
  0x56   :  { %1272 = dma.done.wait [#allocation8], 3072  }
  0x57   :  { %1273 = vsyncadd [#allocation8], 4294964224 }
  0x58   :  { %1274 = dma.done.wait [#allocation11], 1024  }
  0x59   :  { %1275 = vsyncadd [#allocation11], 4294966272  ;;  %vm111_vm0 = vcmask 261120   ;;  %v100_v0 = vld [vmem:[#allocation7] sm:$0xff]  ;;  %v101_v1 = vld [vmem:[#allocation7 + $0x8] sm:$0xff]  ;;  %v1285_v8 = vmov 0.0  }
  0x5a   :  { %v102_v2 = vld [vmem:[#allocation7 + $0x10] sm:$0xff]  ;;  %v1057_v3 = vpack.c.bf16 %v101_v1, %v100_v0  ;;  %v103_v4 = vld [vmem:[#allocation7 + $0x18] sm:$0xff]  ;;  %195 = vst.msk [vmem:[#allocation2 + $0x10] sm:$0xff] %vm111_vm0, %v1285_v8  ;;  %196 = vst.msk [vmem:[#allocation2 + $0x18] sm:$0xff] %vm111_vm0, %v1285_v8  ;;  %vm1287_vm1 = vmmov 0   ;;  %vm773_vm2 = vcmask 253952  }
  0x5b   :  { %v98_v5 = vld [vmem:[#allocation4] sm:$0xff]  ;;  %v1061_v6 = vpack.c.bf16 %v103_v4, %v102_v2  ;;  %v99_v7 = vld [vmem:[#allocation4 + $0x8] sm:$0xff]  ;;  %193 = vst.msk [vmem:[#allocation2] sm:$0xff] %vm111_vm0, %v1285_v8  ;;  %194 = vst.msk [vmem:[#allocation2 + $0x8] sm:$0xff] %vm111_vm0, %v1285_v8  ;;  %s1288_s22 = smov [#allocation13]  }
  0x5c   :  { %973 = vmatprep.mubr.msk.f32.mxu0 %vm111_vm0, %v98_v5  ;;  %1058 = vmatprep.subr.bf16.mxu0 %v1057_v3  ;;  %197 = vst.msk [vmem:[#allocation2 + $0x20] sm:$0xff] %vm111_vm0, %v1285_v8  ;;  %v416_v9 = vld [vmem:[#allocation9 + $0x40] sm:$0xff]  ;;  %v417_v10 = vld [vmem:[#allocation9 + $0x48] sm:$0xff]  ;;  %v418_v15 = vld [vmem:[#allocation9 + $0x50] sm:$0xff]  ;;  %s877_s23 = sshll.u32 %s1288_s22, 4  ;;  %s878_s23 = int_to_ptr.vmem [resolvable:$true] %s877_s23 }
  0x5d   :  { %1060 = vmatpush3.bf16.msra.mxu0 %v1057_v3  ;;  %v213_v11 = vld [vmem:[#allocation9 + $0x20] sm:$0xff]  ;;  %v1081_v12 = vpack.c.bf16 %v417_v10, %v416_v9  ;;  %v214_v13 = vld [vmem:[#allocation9 + $0x28] sm:$0xff]  ;;  %v419_v16 = vld [vmem:[#allocation9 + $0x58] sm:$0xff]  ;;  %v1286_v3 = vmov 0.0|0.0   ;;  %s1248_s24 = scalar_lea.vmem %s878_s23, 32  ;;  %p1253_p13 = scmp.lt.s32.totalorder %s878_s23, %s878_s23 }
  0x5e   :  { %1062 = vmatprep.subr.bf16.mxu0 %v1061_v6  ;;  %v1065_v14 = vpack.c.bf16 %v214_v13, %v213_v11  ;;  %v215_v17 = vld [vmem:[#allocation9 + $0x30] sm:$0xff]  ;;  %v1085_v18 = vpack.c.bf16 %v419_v16, %v418_v15  ;;  %v216_v19 = vld [vmem:[#allocation9 + $0x38] sm:$0xff]  ;;  %v526_v21 = vld [vmem:[#allocation9 + $0x60] sm:$0xff]  ;;  %p1249_p12 = scmp.ne.s32.totalorder %s878_s23, %s1248_s24  ;;  %p1254_p0 = scmp.lt.s32.totalorder %s1248_s24, %s1248_s24 }
  0x5f   :  { %1082 = vmatprep.subr.bf16.mxu1 %v1081_v12  ;;  %v1069_v20 = vpack.c.bf16 %v216_v19, %v215_v17  ;;  %v527_v22 = vld [vmem:[#allocation9 + $0x68] sm:$0xff]  ;;  %v204_v23 = vld [vmem:[#allocation9] sm:$0xff]  ;;  %v528_v32 = vld [vmem:[#allocation9 + $0x70] sm:$0xff] }
  0x60   :  { %1084 = vmatpush3.bf16.msra.mxu1 %v1081_v12  ;;  %v1089_v24 = vpack.c.bf16 %v527_v22, %v526_v21  ;;  %v205_v25 = vld [vmem:[#allocation9 + $0x8] sm:$0xff]  ;;  %v888_v27 = vld [vmem:[%s1486_s2] ss:$0 sm:$0xff]  ;;  %v529_v33 = vld [vmem:[#allocation9 + $0x78] sm:$0xff]  ;;  %p1255_p1 = por %p1254_p0, %p1253_p13 }
  0x61   :  { %1064 = vmatpush3.bf16.msra.mxu0 %v1061_v6  ;;  %1086 = vmatprep.subr.bf16.mxu1 %v1085_v18  ;;  %v1073_v26 = vpack.c.bf16 %v205_v25, %v204_v23  ;;  %v206_v34 = vld [vmem:[#allocation9 + $0x10] sm:$0xff]  ;;  %v207_v35 = vld [vmem:[#allocation9 + $0x18] sm:$0xff]  ;;  %v1093_v40 = vpack.c.bf16 %v529_v33, %v528_v32  ;;  %v636_v43 = vld [vmem:[#allocation9 + $0x80] sm:$0xff] }
  0x62   :  { %1066 = vmatprep.subr.bf16.mxu0 %v1065_v14  ;;  %v1077_v41 = vpack.c.bf16 %v207_v35, %v206_v34  ;;  %v637_v44 = vld [vmem:[#allocation9 + $0x88] sm:$0xff]  ;;  %v638_v50 = vld [vmem:[#allocation9 + $0x90] sm:$0xff]  ;;  %v639_v51 = vld [vmem:[#allocation9 + $0x98] sm:$0xff]  ;;  %p1256_p2 = pnand %p1255_p1, %p1249_p12 }
  0x63   :  { %v1097_v48 = vpack.c.bf16 %v637_v44, %v636_v43  ;;  %v1101_v54 = vpack.c.bf16 %v639_v51, %v638_v50  ;;  %v632_v61 = vld [vmem:[#allocation2 + $0xc] sm:$0xff]  ;;  %v634_v63 = vld [vmem:[#allocation2 + $0x1c] sm:$0xff] }
  0x64   :  { %974 = vmatmul.mubr.msk.f32.vlgmr.msra.gmra.mrb[0].mxu0 %vm111_vm0, %v99_v7  ;;  %1088 = vmatpush3.bf16.msra.mxu1 %v1085_v18  ;;  %v786_v0 = vld [vmem:[#allocation12] sm:$0xff]  ;;  %v787_v1 = vld [vmem:[#allocation12 + $0x8] sm:$0xff]  ;;  %v788_v2 = vld [vmem:[#allocation12 + $0x10] sm:$0xff] }
  0x65   :  { %1068 = vmatpush3.bf16.msra.mxu0 %v1065_v14  ;;  %1090 = vmatprep.subr.bf16.mxu1 %v1089_v24  ;;  %v1106_v4 = vpack.c.bf16 %v787_v1, %v786_v0  ;;  %v789_v5 = vld [vmem:[#allocation12 + $0x18] sm:$0xff]  ;;  %v911_v13 = vld [vmem:[%s1488_s4] ss:$0 sm:$0xff]  ;;  %v757_v18 = vld [vmem:[#allocation10 + $0x8] sm:$0xff] }
  0x66   :  { %1070 = vmatprep.subr.bf16.mxu0 %v1069_v20  ;;  %v1109_v6 = vpack.c.bf16 %v789_v5, %v788_v2  ;;  %v756_v21 = vld [vmem:[#allocation10] sm:$0xff]  ;;  %v758_v33 = vld [vmem:[#allocation10 + $0x10] sm:$0xff] }
  0x69   :  { %1072 = vmatpush3.bf16.msra.mxu0 %v1069_v20 }
  0x6a   :  { %1074 = vmatprep.subr.bf16.mxu0 %v1073_v26 }
 0x137   :  { %v975_v28 = vpop.f32.mrb[0].mxu0 }
 0x138   :  { %v190_v29 = vadd.f32 %v975_v28, %v888_v27  ;;  %v184_v30 = vpop.f32.mrb[1].mxu0 }
 0x139   :  { %v185_v31 = vadd.f32 %v888_v27, %v184_v30 }
 0x13a   :  { %199 = vst.msk [vmem:[#allocation2 + $0x14] sm:$0xff] %vm111_vm0, %v190_v29  ;;  %v759_v29 = vld [vmem:[#allocation10 + $0x18] sm:$0xff] }
 0x13b   :  { %198 = vst.msk [vmem:[#allocation2 + $0x4] sm:$0xff] %vm111_vm0, %v185_v31 }
 0x141   :  { %v210_v42 = vld [vmem:[#allocation2 + $0x11] sm:$0xff]  ;;  %v211_v46 = vld [vmem:[#allocation2 + $0x19] sm:$0xff] }
 0x142   :  { %v208_v36 = vld [vmem:[#allocation2 + $0x1] sm:$0xff]  ;;  %v209_v38 = vld [vmem:[#allocation2 + $0x9] sm:$0xff]  ;;  %v413_v45 = vld [vmem:[#allocation2 + $0x12] sm:$0xff] }
 0x143   :  { %v411_v37 = vld [vmem:[#allocation2 + $0x2] sm:$0xff]  ;;  %984 = vmatprep.mubr.msk.f32.mxu0 %vm111_vm0, %v208_v36  ;;  %v412_v39 = vld [vmem:[#allocation2 + $0xa] sm:$0xff]  ;;  %v414_v47 = vld [vmem:[#allocation2 + $0x1a] sm:$0xff] }
 0x144   :  { %1012 = vmatprep.mubr.msk.f32.mxu1 %vm111_vm0, %v411_v37  ;;  %985 = vmatmul.mubr.msk.f32.vlgmr.msra.gmra.mrb[2].mxu0 %vm111_vm0, %v209_v38  ;;  %v200_v49 = vld [vmem:[#allocation2] sm:$0xff]  ;;  %v522_v53 = vld [vmem:[#allocation2 + $0xb] sm:$0xff]  ;;  %v523_v57 = vld [vmem:[#allocation2 + $0x13] sm:$0xff] }
 0x145   :  { %1013 = vmatmul.mubr.msk.f32.vlgmr.msra.gmra.mrb[0].mxu1 %vm111_vm0, %v412_v39  ;;  %987 = vmatprep.mubr.msk.f32.mxu0 %vm111_vm0, %v210_v42  ;;  %v521_v52 = vld [vmem:[#allocation2 + $0x3] sm:$0xff]  ;;  %v202_v56 = vld [vmem:[#allocation2 + $0x10] sm:$0xff]  ;;  %v524_v58 = vld [vmem:[#allocation2 + $0x1b] sm:$0xff] }
 0x146   :  { %1092 = vmatpush3.bf16.msra.mxu1 %v1089_v24  ;;  %1076 = vmatpush3.bf16.msra.mxu0 %v1073_v26  ;;  %v201_v55 = vld [vmem:[#allocation2 + $0x8] sm:$0xff]  ;;  %v203_v59 = vld [vmem:[#allocation2 + $0x18] sm:$0xff] }
 0x147   :  { %1015 = vmatprep.mubr.msk.f32.mxu1 %vm111_vm0, %v413_v45  ;;  %1094 = vmatprep.subr.bf16.mxu1 %v1093_v40  ;;  %v631_v60 = vld [vmem:[#allocation2 + $0x4] sm:$0xff]  ;;  %v633_v62 = vld [vmem:[#allocation2 + $0x14] sm:$0xff] }
 0x148   :  { %1078 = vmatprep.subr.bf16.mxu0 %v1077_v41  ;;  %988 = vmatmul.mubr.msk.f32.gmra.mrb[4].mxu0 %vm111_vm0, %v211_v46 }
 0x149   :  { %1016 = vmatmul.mubr.msk.f32.gmra.mrb[2].mxu1 %vm111_vm0, %v414_v47  ;;  %998 = vmatprep.mubr.msk.f32.mxu0 %vm111_vm0, %v200_v49 }
 0x14a   :  { %1096 = vmatpush3.bf16.msra.mxu1 %v1093_v40  ;;  %1080 = vmatpush3.bf16.msra.mxu0 %v1077_v41 }
 0x14b   :  { %1026 = vmatprep.mubr.msk.f32.mxu1 %vm111_vm0, %v521_v52  ;;  %1098 = vmatprep.subr.bf16.mxu1 %v1097_v48 }
 0x14c   :  { %1105 = vmatprep.subr.bf16.mxu0 %v1286_v3 }
 0x14d   :  { %1027 = vmatmul.mubr.msk.f32.vlgmr.msra.gmra.mrb[0].mxu1 %vm111_vm0, %v522_v53  ;;  %999 = vmatmul.mubr.msk.f32.vlgmr.msra.gmra.mrb[2].mxu0 %vm111_vm0, %v201_v55  ;;  %v912_v55 = vld [vmem:[%s1491_s7] ss:$0 sm:$0xff] }
 0x14e   :  { %1100 = vmatpush3.bf16.msra.mxu1 %v1097_v48  ;;  %1001 = vmatprep.mubr.msk.f32.mxu0 %vm111_vm0, %v202_v56 }
 0x14f   :  { %1029 = vmatprep.mubr.msk.f32.mxu1 %vm111_vm0, %v523_v57  ;;  %1102 = vmatprep.subr.bf16.mxu1 %v1101_v54 }
 0x150   :  { %1107 = vmatpush3.bf16.msra.mxu0 %v1106_v4 }
 0x151   :  { %1030 = vmatmul.mubr.msk.f32.gmra.mrb[2].mxu1 %vm111_vm0, %v524_v58  ;;  %1002 = vmatmul.mubr.msk.f32.gmra.mrb[4].mxu0 %vm111_vm0, %v203_v59 }
 0x152   :  { %1104 = vmatpush3.bf16.msra.mxu1 %v1101_v54  ;;  %1040 = vmatprep.mubr.msk.f32.mxu1 %vm111_vm0, %v631_v60 }
 0x153   :  { %1054 = vmatprep.mubr.msk.f32.mxu0 %vm1287_vm1, %v1285_v8  ;;  %1108 = vmatprep.subr.bf16.mxu0 %v1286_v3 }
 0x154   :  { %1110 = vmatpush3.bf16.msra.mxu0 %v1109_v6 }
 0x155   :  { %1041 = vmatmul.mubr.msk.f32.vlgmr.msra.gmra.mrb[0].mxu1 %vm111_vm0, %v632_v61 }
 0x156   :  { %1043 = vmatprep.mubr.msk.f32.mxu1 %vm111_vm0, %v633_v62 }
 0x159   :  { %1044 = vmatmul.mubr.msk.f32.gmra.mrb[2].mxu1 %vm111_vm0, %v634_v63 }
 0x220   :  { %v1000_v7 = vpop.f32.mrb[2].mxu0 }
 0x221   :  { %v392_v9 = vpop.f32.mrb[3].mxu0 }
 0x224   :  { %v1003_v10 = vpop.f32.mrb[4].mxu0 }
 0x225   :  { %v402_v11 = vpop.f32.mrb[5].mxu0 }
 0x228   :  { %v1042_v12 = vpop.f32.mrb[0].mxu1 }
 0x229   :  { %v1111_v14 = vadd.f32 %v1042_v12, %v1000_v7  ;;  %v718_v15 = vpop.f32.mrb[1].mxu1 }
 0x22a   :  { %v1112_v16 = vadd.f32 %v718_v15, %v392_v9 }
 0x22b   :  { %v749_v17 = vadd.f32 %v1111_v14, %v911_v13 }
 0x22c   :  { %v748_v19 = vadd.f32 %v1112_v16, %v911_v13  ;;  %v1045_v8 = vpop.f32.mrb[2].mxu1 }
 0x22d   :  { %v753_v20 = vmax.f32 %v749_v17, 0.0  ;;  %v1113_v22 = vadd.f32 %v1045_v8, %v1003_v10  ;;  %v728_v23 = vpop.f32.mrb[3].mxu1 }
 0x22e   :  { %v752_v24 = vmax.f32 %v748_v19, 0.0  ;;  %v1114_v25 = vadd.f32 %v728_v23, %v402_v11 }
 0x22f   :  { %v761_v26 = vmul.f32 %v757_v18, %v753_v20  ;;  %v751_v27 = vadd.f32 %v1113_v22, %v911_v13 }
 0x230   :  { %v760_v28 = vmul.f32 %v756_v21, %v752_v24  ;;  %v750_v30 = vadd.f32 %v1114_v25, %v911_v13 }
 0x231   :  { %v765_v31 = vsel %vm111_vm0, %v761_v26, -inf  ;;  %v755_v32 = vmax.f32 %v751_v27, 0.0 }
 0x232   :  { %v764_v34 = vsel %vm111_vm0, %v760_v28, -inf  ;;  %v754_v35 = vmax.f32 %v750_v30, 0.0 }
 0x233   :  { %v766_v36 = vmax.f32 %v764_v34, %v765_v31  ;;  %v763_v37 = vmul.f32 %v759_v29, %v755_v32 }
 0x234   :  { %v762_v38 = vmul.f32 %v758_v33, %v754_v35 }
 0x235   :  { %v767_v39 = vrot.slane %v766_v36, 4  ;;  %v776_v40 = vsel %vm111_vm0, %v763_v37, -inf }
 0x236   :  { %v775_v41 = vsel %vm111_vm0, %v762_v38, -inf }
 0x237   :  { %v768_v42 = vmax.f32 %v766_v36, %v767_v39  ;;  %v777_v43 = vmax.f32 %v775_v41, %v776_v40 }
 0x239   :  { %v769_v44 = vrot.slane %v768_v42, 2  ;;  %v778_v45 = vrot.slane %v777_v43, 4 }
 0x23b   :  { %v770_v46 = vmax.f32 %v768_v42, %v769_v44  ;;  %v779_v47 = vmax.f32 %v777_v43, %v778_v45 }
 0x23d   :  { %v771_v48 = vrot.slane %v770_v46, 1  ;;  %v780_v49 = vrot.slane %v779_v47, 2 }
 0x23f   :  { %v772_v50 = vmax.f32 %v770_v46, %v771_v48  ;;  %v781_v51 = vmax.f32 %v779_v47, %v780_v49 }
 0x241   :  { %774 = vst.msk [vmem:[#allocation3] sm:$0x1] %vm773_vm2, %v772_v50  ;;  %v782_v52 = vrot.slane %v781_v51, 1 }
 0x243   :  { %v783_v53 = vmax.f32 %v781_v51, %v782_v52 }
 0x245   :  { %784 = vst.msk [vmem:[#allocation3 + $0x1] sm:$0x1] %vm773_vm2, %v783_v53 }
 0x24c   :  { %v785_v54 = vld [vmem:[#allocation3] sm:$0x3] }
 0x24d   :  { %1055 = vmatmul.mubr.msk.f32.vlgmr.msra.gmra.mrb[6].mxu0 %vm111_vm0, %v785_v54 }
 0x320   :  { %v866_v56 = vpop.f32.mrb[6].mxu0 }
 0x321   :  { %v867_v57 = vadd.f32 %v912_v55, %v866_v56  ;;  %v1056_v58 = vpop.f32.mrb[7].mxu0 }
 0x323   :  { %870 = vst [vmem:[#allocation13] sm:$0x3] %v867_v57 }
 0x324   :  { %1259 = shalt.err (!%p1256_p2)
}
 0x325   :  { %s1260_s27 = scalar_lea.hbm %s1492_s8, 32 }
 0x326   :  { %p1261_p3 = scmp.ne.s32.totalorder %s1492_s8, %s1260_s27  ;;  %p1264_p4 = scmp.lt.u32.totalorder %s1260_s27, %s1492_s8 }
 0x328   :  { %p1266_p5 = pnand %p1264_p4, %p1261_p3 }
 0x32a   :  { %1269 = shalt.err (!%p1266_p5)
}
 0x32b   :  { %880 = dma.vmem_to_hbm [thread:$0]  %s878_s23, 32, %s1492_s8, [#allocation6]  }
 0x32c   :  { %1276 = dma.done.wait [#allocation6], 32  }
 0x32d   :  { %1277 = vsyncadd [#allocation6], 4294967264 }
 0x32e   :  { %884 = vsyncpa [#allocation5], 1 }
 0x32f   :  { %885 = vsyncpa [#allocation8], 1 }
 0x330   :  { %886 = vsyncpa [#allocation11], 1 }
 0x331   :  { %887 = vsyncpa [#allocation6], 1 }

</bundles_post_ra>
